<compile_context>
chip_gen: v7x
topology: tpu7x:2x2x1
jax: 0.10.0
libtpu: 0.0.40
codegen_flags: <defaults>
</compile_context>

<pallas_src>
import functools

import jax
import jax.numpy as jnp
from jax.experimental import pallas as pl
from jax.experimental.pallas import tpu as pltpu

_LANE = 128
_SUBLANE = 8


def _round_up(x, m):
    return ((x + m - 1) // m) * m


def _diff_loss_kernel(x1_ref, x2_ref, o_ref, m1_acc, m2_acc, *,
                      f1, f2, t1, t2, mask1, mask2, inv_f1f2):
    step = pl.program_id(0)

    @pl.when(step == 0)
    def _init():
        m1_acc[...] = jnp.zeros_like(m1_acc)
        m2_acc[...] = jnp.zeros_like(m2_acc)

    def _accumulate(x_ref, acc_ref, f_total, tile, needs_mask):
        x = x_ref[...].astype(jnp.float32)                       # [B, tile]
        if needs_mask:
            # The last tile may read past the true feature extent; zero those
            # columns so they contribute nothing to the mean or the Gram.
            col = jax.lax.broadcasted_iota(jnp.int32, x.shape, 1)
            valid = f_total - step * tile
            x = jnp.where(col < valid, x, 0.0)
        # Batch-mean centering is per feature column -> exact per tile.
        xc = x - jnp.mean(x, axis=0, keepdims=True)
        # Partial batch Gram: contract over the feature tile, f32 accumulation.
        acc_ref[...] += jax.lax.dot_general(
            xc, xc,
            dimension_numbers=(((1,), (1,)), ((), ())),
            preferred_element_type=jnp.float32,
        )

    _accumulate(x1_ref, m1_acc, f1, t1, mask1)
    _accumulate(x2_ref, m2_acc, f2, t2, mask2)

    @pl.when(step == pl.num_programs(0) - 1)
    def _finalize():
        m1 = m1_acc[...]
        m2 = m2_acc[...]
        b = m1.shape[0]
        rows = jax.lax.broadcasted_iota(jnp.int32, (b, b), 0)
        cols = jax.lax.broadcasted_iota(jnp.int32, (b, b), 1)
        eye = rows == cols
        # Per-sample L2 norms come for free from the Gram diagonals.
        d1 = jnp.where(eye, m1, 0.0)
        d2 = jnp.where(eye, m2, 0.0)
        n1c = jnp.sqrt(jnp.sum(d1, axis=1, keepdims=True)) + 1e-6   # [B,1]
        n1r = jnp.sqrt(jnp.sum(d1, axis=0, keepdims=True)) + 1e-6   # [1,B]
        n2c = jnp.sqrt(jnp.sum(d2, axis=1, keepdims=True)) + 1e-6
        n2r = jnp.sqrt(jnp.sum(d2, axis=0, keepdims=True)) + 1e-6
        g1 = m1 / (n1c * n1r)    # (n_i + eps)*(n_j + eps), matching x/(norm+eps)
        g2 = m2 / (n2c * n2r)
        total = jnp.sum(g1 * g2)
        o_ref[...] = (total * inv_f1f2).reshape(1, 1)


def diff_loss(input1, input2, *, max_tile=8192,
              vmem_input_budget_bytes=16 * 1024 * 1024):
    """Pallas equivalent of DiffLoss.forward(input1, input2)."""
    b = input1.shape[0]
    assert input2.shape[0] == b
    x1 = input1.reshape(b, -1)   # keep original dtype; kernel casts to f32
    x2 = input2.reshape(b, -1)
    f1 = x1.shape[1]
    f2 = x2.shape[1]

    # Feature-tile width: 2 inputs x 2 pipeline buffers of [B_pad, tile] f32
    # must fit the VMEM budget (kept well under v7x's 64 MiB / 32 MiB scoped).
    b_pad = _round_up(b, _SUBLANE)
    budget_cols = vmem_input_budget_bytes // (4 * b_pad * 4)
    tile_cap = max(_LANE, min(max_tile, (budget_cols // _LANE) * _LANE))

    num_tiles = max(pl.cdiv(f1, tile_cap), pl.cdiv(f2, tile_cap))

    def _plan(x, f_true):
        if num_tiles == 1:
            return x, f_true, False            # single full-width block
        tile = _round_up(pl.cdiv(f_true, num_tiles), _LANE)
        if pl.cdiv(f_true, tile) < num_tiles:
            # Rare (only when f1 and f2 differ a lot): zero-pad so every grid
            # step maps to an in-bounds block.  Zero columns contribute 0.
            x = jnp.pad(x, ((0, 0), (0, tile * num_tiles - f_true)))
            return x, tile, False
        return x, tile, tile * num_tiles != f_true

    x1, t1, mask1 = _plan(x1, f1)
    x2, t2, mask2 = _plan(x2, f2)

    kernel = functools.partial(
        _diff_loss_kernel,
        f1=f1, f2=f2, t1=t1, t2=t2, mask1=mask1, mask2=mask2,
        inv_f1f2=1.0 / float(f1 * f2),
    )

    out = pl.pallas_call(
        kernel,
        out_shape=jax.ShapeDtypeStruct((1, 1), jnp.float32),
        grid_spec=pltpu.PrefetchScalarGridSpec(
            num_scalar_prefetch=0,
            grid=(num_tiles,),
            in_specs=[
                pl.BlockSpec((b, t1), lambda s: (0, s)),
                pl.BlockSpec((b, t2), lambda s: (0, s)),
            ],
            out_specs=pl.BlockSpec((1, 1), lambda s: (0, 0)),
            scratch_shapes=[
                pltpu.VMEM((b, b), jnp.float32),
                pltpu.VMEM((b, b), jnp.float32),
            ],
        ),
        compiler_params=pltpu.CompilerParams(
            dimension_semantics=("arbitrary",),
        ),
    )(x1, x2)
    return out[0, 0]


def _diff_loss_ref(input1, input2):
    """Pure-JAX reference mirroring the PyTorch module exactly."""
    b = input1.shape[0]
    x1 = input1.reshape(b, -1).astype(jnp.float32)
    x2 = input2.reshape(b, -1).astype(jnp.float32)
    x1 = x1 - jnp.mean(x1, axis=0, keepdims=True)
    x2 = x2 - jnp.mean(x2, axis=0, keepdims=True)
    n1 = jnp.linalg.norm(x1, axis=1, keepdims=True)
    n2 = jnp.linalg.norm(x2, axis=1, keepdims=True)
    x1n = x1 / (n1 + 1e-6)
    x2n = x2 / (n2 + 1e-6)
    g = jnp.dot(x1n.T, x2n, precision=jax.lax.Precision.HIGHEST)
    return jnp.mean(g ** 2)


if __name__ == "__main__":
    key = jax.random.PRNGKey(0)
    k1, k2, k3, k4 = jax.random.split(key, 4)

    # Typical DiffLoss usage: two same-shaped representations [batch, seq, hidden].
    input1 = jax.random.normal(k1, (2, 8, 32), dtype=jnp.float32)
    input2 = jax.random.normal(k2, (2, 8, 32), dtype=jnp.float32)

    out = diff_loss(input1, input2)
    jax.block_until_ready(out)
    ref = _diff_loss_ref(input1, input2)
    assert jnp.allclose(out, ref, rtol=5e-3, atol=1e-7), (out, ref)

    # Exercise the multi-step tiled-reduction path.
    out_tiled = diff_loss(input1, input2, max_tile=128)
    jax.block_until_ready(out_tiled)
    assert jnp.allclose(out_tiled, ref, rtol=5e-3, atol=1e-7), (out_tiled, ref)

    # Exercise the masked partial-last-tile path (feature dim not 128-aligned).
    input3 = jax.random.normal(k3, (4, 8, 40), dtype=jnp.float32)
    input4 = jax.random.normal(k4, (4, 8, 40), dtype=jnp.float32)
    out_masked = diff_loss(input3, input4, max_tile=128)
    jax.block_until_ready(out_masked)
    ref_masked = _diff_loss_ref(input3, input4)
    assert jnp.allclose(out_masked, ref_masked, rtol=5e-3, atol=1e-7), (
        out_masked, ref_masked)

    print("KERNEL_OK")
</pallas_src>

<mosaic_0001>
module attributes {stable_mosaic.version = 11 : i64} {
  func.func @_diff_loss_kernel(%arg0: i32, %arg1: memref<2x256xf32, #tpu.memory_space<vmem>>, %arg2: memref<2x256xf32, #tpu.memory_space<vmem>>, %arg3: memref<1x1xf32, #tpu.memory_space<vmem>>, %arg4: memref<2x2xf32, #tpu.memory_space<vmem>>, %arg5: memref<2x2xf32, #tpu.memory_space<vmem>>) attributes {dimension_semantics = [#tpu.dimension_semantics<arbitrary>], iteration_bounds = array<i64: 1>, scalar_prefetch = 0 : i64, scratch_operands = 2 : i64, tpu.core_type = #tpu.core_type<tc>, window_params = [{transform_indices = @transform_0, window_bounds = array<i64: 2, 256>}, {transform_indices = @transform_1, window_bounds = array<i64: 2, 256>}, {pipeline_mode = #tpu.pipeline_mode<synchronous>, transform_indices = @transform_2, window_bounds = array<i64: 1, 1>}]} {
    %c0_i32 = arith.constant 0 : i32
    %0 = arith.cmpi eq, %arg0, %c0_i32 : i32
    %1 = arith.extui %0 : i1 to i32
    %c0_i32_0 = arith.constant 0 : i32
    %2 = arith.cmpi ne, %1, %c0_i32_0 : i32
    scf.if %2 {
      %cst_19 = arith.constant 0.000000e+00 : f32
      %28 = vector.broadcast %cst_19 : f32 to vector<2x2xf32>
      %c0_20 = arith.constant 0 : index
      %c0_21 = arith.constant 0 : index
      %29 = vector.load %arg4[%c0_20, %c0_21] : memref<2x2xf32, #tpu.memory_space<vmem>>, vector<2x2xf32>
      tpu.vector_store %arg4[%c0_20, %c0_21], %28 {strides = array<i32>} : memref<2x2xf32, #tpu.memory_space<vmem>>, vector<2x2xf32>,
      %cst_22 = arith.constant 0.000000e+00 : f32
      %30 = vector.broadcast %cst_22 : f32 to vector<2x2xf32>
      %c0_23 = arith.constant 0 : index
      %c0_24 = arith.constant 0 : index
      %31 = vector.load %arg5[%c0_23, %c0_24] : memref<2x2xf32, #tpu.memory_space<vmem>>, vector<2x2xf32>
      tpu.vector_store %arg5[%c0_23, %c0_24], %30 {strides = array<i32>} : memref<2x2xf32, #tpu.memory_space<vmem>>, vector<2x2xf32>,
    } else {
    }
    %c0 = arith.constant 0 : index
    %c0_1 = arith.constant 0 : index
    %3 = vector.load %arg1[%c0, %c0_1] : memref<2x256xf32, #tpu.memory_space<vmem>>, vector<2x256xf32>
    %cst = arith.constant dense<0.000000e+00> : vector<256xf32>
    %4 = vector.multi_reduction <add>, %3, %cst [0] : vector<2x256xf32> to vector<256xf32>
    %5 = vector.shape_cast %4 : vector<256xf32> to vector<1x256xf32>
    %cst_2 = arith.constant 2.000000e+00 : f32
    %6 = vector.broadcast %cst_2 : f32 to vector<1x256xf32>
    %7 = arith.divf %5, %6 : vector<1x256xf32>
    %8 = vector.broadcast %7 : vector<1x256xf32> to vector<2x256xf32>
    %9 = arith.subf %3, %8 : vector<2x256xf32>
    %c0_3 = arith.constant 0 : index
    %c0_4 = arith.constant 0 : index
    %10 = vector.load %arg4[%c0_3, %c0_4] : memref<2x2xf32, #tpu.memory_space<vmem>>, vector<2x2xf32>
    %cst_5 = arith.constant dense<0.000000e+00> : vector<2x2xf32>
    %11 = tpu.matmul %9, %9, %cst_5 {dimension_numbers = #tpu.dot_dimension_numbers<[1], [1], [0], [0], [0, 0, 1, 0], [], []>} : vector<2x256xf32>, vector<2x256xf32>, vector<2x2xf32> -> vector<2x2xf32>
    %12 = arith.addf %10, %11 : vector<2x2xf32>
    %c0_6 = arith.constant 0 : index
    %c0_7 = arith.constant 0 : index
    %13 = vector.load %arg4[%c0_6, %c0_7] : memref<2x2xf32, #tpu.memory_space<vmem>>, vector<2x2xf32>
    tpu.vector_store %arg4[%c0_6, %c0_7], %12 {strides = array<i32>} : memref<2x2xf32, #tpu.memory_space<vmem>>, vector<2x2xf32>,
    %c0_8 = arith.constant 0 : index
    %c0_9 = arith.constant 0 : index
    %14 = vector.load %arg2[%c0_8, %c0_9] : memref<2x256xf32, #tpu.memory_space<vmem>>, vector<2x256xf32>
    %cst_10 = arith.constant dense<0.000000e+00> : vector<256xf32>
    %15 = vector.multi_reduction <add>, %14, %cst_10 [0] : vector<2x256xf32> to vector<256xf32>
    %16 = vector.shape_cast %15 : vector<256xf32> to vector<1x256xf32>
    %cst_11 = arith.constant 2.000000e+00 : f32
    %17 = vector.broadcast %cst_11 : f32 to vector<1x256xf32>
    %18 = arith.divf %16, %17 : vector<1x256xf32>
    %19 = vector.broadcast %18 : vector<1x256xf32> to vector<2x256xf32>
    %20 = arith.subf %14, %19 : vector<2x256xf32>
    %c0_12 = arith.constant 0 : index
    %c0_13 = arith.constant 0 : index
    %21 = vector.load %arg5[%c0_12, %c0_13] : memref<2x2xf32, #tpu.memory_space<vmem>>, vector<2x2xf32>
    %cst_14 = arith.constant dense<0.000000e+00> : vector<2x2xf32>
    %22 = tpu.matmul %20, %20, %cst_14 {dimension_numbers = #tpu.dot_dimension_numbers<[1], [1], [0], [0], [0, 0, 1, 0], [], []>} : vector<2x256xf32>, vector<2x256xf32>, vector<2x2xf32> -> vector<2x2xf32>
    %23 = arith.addf %21, %22 : vector<2x2xf32>
    %c0_15 = arith.constant 0 : index
    %c0_16 = arith.constant 0 : index
    %24 = vector.load %arg5[%c0_15, %c0_16] : memref<2x2xf32, #tpu.memory_space<vmem>>, vector<2x2xf32>
    tpu.vector_store %arg5[%c0_15, %c0_16], %23 {strides = array<i32>} : memref<2x2xf32, #tpu.memory_space<vmem>>, vector<2x2xf32>,
    %c0_i32_17 = arith.constant 0 : i32
    %25 = arith.cmpi eq, %arg0, %c0_i32_17 : i32
    %26 = arith.extui %25 : i1 to i32
    %c0_i32_18 = arith.constant 0 : i32
    %27 = arith.cmpi ne, %26, %c0_i32_18 : i32
    scf.if %27 {
      %c0_19 = arith.constant 0 : index
      %c0_20 = arith.constant 0 : index
      %28 = vector.load %arg4[%c0_19, %c0_20] : memref<2x2xf32, #tpu.memory_space<vmem>>, vector<2x2xf32>
      %c0_21 = arith.constant 0 : index
      %c0_22 = arith.constant 0 : index
      %29 = vector.load %arg5[%c0_21, %c0_22] : memref<2x2xf32, #tpu.memory_space<vmem>>, vector<2x2xf32>
      %30 = tpu.iota {dimensions = array<i32: 0>} : vector<2x2xi32>
      %31 = tpu.iota {dimensions = array<i32: 1>} : vector<2x2xi32>
      %32 = arith.cmpi eq, %30, %31 : vector<2x2xi32>
      %cst_23 = arith.constant 0.000000e+00 : f32
      %33 = vector.broadcast %cst_23 : f32 to vector<2x2xf32>
      %34 = arith.select %32, %28, %33 : vector<2x2xi1>, vector<2x2xf32>
      %cst_24 = arith.constant 0.000000e+00 : f32
      %35 = vector.broadcast %cst_24 : f32 to vector<2x2xf32>
      %36 = arith.select %32, %29, %35 : vector<2x2xi1>, vector<2x2xf32>
      %cst_25 = arith.constant dense<0.000000e+00> : vector<2xf32>
      %37 = vector.multi_reduction <add>, %34, %cst_25 [1] : vector<2x2xf32> to vector<2xf32>
      %38 = vector.shape_cast %37 : vector<2xf32> to vector<2x1xf32>
      %39 = math.sqrt %38 : vector<2x1xf32>
      %cst_26 = arith.constant 9.99999997E-7 : f32
      %40 = vector.broadcast %cst_26 : f32 to vector<2x1xf32>
      %41 = arith.addf %39, %40 : vector<2x1xf32>
      %cst_27 = arith.constant dense<0.000000e+00> : vector<2xf32>
      %42 = vector.multi_reduction <add>, %34, %cst_27 [0] : vector<2x2xf32> to vector<2xf32>
      %43 = vector.shape_cast %42 : vector<2xf32> to vector<1x2xf32>
      %44 = math.sqrt %43 : vector<1x2xf32>
      %cst_28 = arith.constant 9.99999997E-7 : f32
      %45 = vector.broadcast %cst_28 : f32 to vector<1x2xf32>
      %46 = arith.addf %44, %45 : vector<1x2xf32>
      %cst_29 = arith.constant dense<0.000000e+00> : vector<2xf32>
      %47 = vector.multi_reduction <add>, %36, %cst_29 [1] : vector<2x2xf32> to vector<2xf32>
      %48 = vector.shape_cast %47 : vector<2xf32> to vector<2x1xf32>
      %49 = math.sqrt %48 : vector<2x1xf32>
      %cst_30 = arith.constant 9.99999997E-7 : f32
      %50 = vector.broadcast %cst_30 : f32 to vector<2x1xf32>
      %51 = arith.addf %49, %50 : vector<2x1xf32>
      %cst_31 = arith.constant dense<0.000000e+00> : vector<2xf32>
      %52 = vector.multi_reduction <add>, %36, %cst_31 [0] : vector<2x2xf32> to vector<2xf32>
      %53 = vector.shape_cast %52 : vector<2xf32> to vector<1x2xf32>
      %54 = math.sqrt %53 : vector<1x2xf32>
      %cst_32 = arith.constant 9.99999997E-7 : f32
      %55 = vector.broadcast %cst_32 : f32 to vector<1x2xf32>
      %56 = arith.addf %54, %55 : vector<1x2xf32>
      %57 = vector.broadcast %41 : vector<2x1xf32> to vector<2x2xf32>
      %58 = vector.broadcast %46 : vector<1x2xf32> to vector<2x2xf32>
      %59 = arith.mulf %57, %58 : vector<2x2xf32>
      %60 = arith.divf %28, %59 : vector<2x2xf32>
      %61 = vector.broadcast %51 : vector<2x1xf32> to vector<2x2xf32>
      %62 = vector.broadcast %56 : vector<1x2xf32> to vector<2x2xf32>
      %63 = arith.mulf %61, %62 : vector<2x2xf32>
      %64 = arith.divf %29, %63 : vector<2x2xf32>
      %65 = arith.mulf %60, %64 : vector<2x2xf32>
      %66 = vector.shape_cast %65 : vector<2x2xf32> to vector<1x2x2xf32>
      %cst_33 = arith.constant dense<0.000000e+00> : vector<1xf32>
      %67 = vector.multi_reduction <add>, %66, %cst_33 [1, 2] : vector<1x2x2xf32> to vector<1xf32>
      %68 = vector.shape_cast %67 : vector<1xf32> to vector<1x1x1xf32>
      %69 = vector.extract %68[0, 0, 0] : f32 from vector<1x1x1xf32>
      %cst_34 = arith.constant 1.52587891E-5 : f32
      %70 = arith.mulf %69, %cst_34 : f32
      %71 = vector.broadcast %70 : f32 to vector<1x1xf32>
      %c0_35 = arith.constant 0 : index
      %c0_36 = arith.constant 0 : index
      %72 = vector.load %arg3[%c0_35, %c0_36] : memref<1x1xf32, #tpu.memory_space<vmem>>, vector<1x1xf32>
      tpu.vector_store %arg3[%c0_35, %c0_36], %71 {strides = array<i32>} : memref<1x1xf32, #tpu.memory_space<vmem>>, vector<1x1xf32>,
    } else {
    }
    return
  }
  func.func @transform_0(%arg0: i32) -> (i32, i32) {
    %c0_i32 = arith.constant 0 : i32
    %c0_i32_0 = arith.constant 0 : i32
    return %c0_i32, %arg0 : i32, i32
  }
  func.func @transform_1(%arg0: i32) -> (i32, i32) {
    %c0_i32 = arith.constant 0 : i32
    %c0_i32_0 = arith.constant 0 : i32
    return %c0_i32, %arg0 : i32, i32
  }
  func.func @transform_2(%arg0: i32) -> (i32, i32) {
    %c0_i32 = arith.constant 0 : i32
    %c0_i32_0 = arith.constant 0 : i32
    %c0_i32_1 = arith.constant 0 : i32
    return %c0_i32, %c0_i32_0 : i32, i32
  }
}

</mosaic_0001>

<bundles_post_ra>
// kernel: tpu_custom_call.1
= control target key start
LH: loop header
LB: loop body
LE: loop exit
PB: predicated region body
PF: predicated region fallthrough
CT: control target
= control target key end

     0   :  { %7 = vsyncpa [#allocation5], 0  ;;  %s561_s0 = inlined_call_operand.hbm [shape: f32[2,256], index: 0, kind: input, shape index: {}]   ;;  %s562_s1 = inlined_call_operand.hbm [shape: f32[2,256], index: 1, kind: input, shape index: {}]   ;;  %s563_s2 = inlined_call_operand.hbm [shape: f32[1,1], index: 2, kind: output, shape index: {}]  }
   0x1   :  { %8 = vsyncpa [#allocation8], 0 }
   0x2   :  { %9 = vsyncpa [#allocation6], 0  ;;  %s484_s9 = smov [#allocation4]   ;;  %s485_s11 = smov [#allocation7]  }
   0x3   :  { %s16_s10 = sshll.u32 %s484_s9, 4  ;;  %s26_s12 = sshll.u32 %s485_s11, 4  ;;  %s17_s10 = int_to_ptr.vmem [resolvable:$true] %s16_s10  ;;  %s27_s12 = int_to_ptr.vmem [resolvable:$true] %s26_s12 }
   0x4   :  { %s412_s15 = scalar_lea.hbm %s561_s0, 64 }
   0x5   :  { %p413_p0 = scmp.ne.s32.totalorder %s561_s0, %s412_s15  ;;  %p416_p1 = scmp.lt.u32.totalorder %s412_s15, %s561_s0 }
   0x7   :  { %p418_p2 = pnand %p416_p1, %p413_p0 }
   0x9   :  { %421 = shalt.err (!%p418_p2)
}
   0xa   :  { %s422_s20 = scalar_lea.vmem %s17_s10, 64  ;;  %p427_p4 = scmp.lt.s32.totalorder %s17_s10, %s17_s10 }
   0xb   :  { %p423_p3 = scmp.ne.s32.totalorder %s17_s10, %s422_s20  ;;  %p428_p5 = scmp.lt.s32.totalorder %s422_s20, %s422_s20 }
   0xd   :  { %p429_p6 = por %p428_p5, %p427_p4 }
   0xf   :  { %p430_p7 = pnand %p429_p6, %p423_p3 }
  0x11   :  { %433 = shalt.err (!%p430_p7)
}
  0x12   :  { %19 = dma.hbm_to_vmem [thread:$0]  %s561_s0, 64, %s17_s10, [#allocation5]  }
  0x13   :  { %s434_s25 = scalar_lea.hbm %s562_s1, 64 }
  0x14   :  { %p435_p8 = scmp.ne.s32.totalorder %s562_s1, %s434_s25  ;;  %p438_p9 = scmp.lt.u32.totalorder %s434_s25, %s562_s1 }
  0x16   :  { %p440_p10 = pnand %p438_p9, %p435_p8 }
  0x18   :  { %443 = shalt.err (!%p440_p10)
}
  0x19   :  { %s444_s30 = scalar_lea.vmem %s27_s12, 64  ;;  %p449_p12 = scmp.lt.s32.totalorder %s27_s12, %s27_s12 }
  0x1a   :  { %p445_p11 = scmp.ne.s32.totalorder %s27_s12, %s444_s30  ;;  %p450_p13 = scmp.lt.s32.totalorder %s444_s30, %s444_s30 }
  0x1c   :  { %p451_p0 = por %p450_p13, %p449_p12 }
  0x1e   :  { %p452_p1 = pnand %p451_p0, %p445_p11 }
  0x20   :  { %455 = shalt.err (!%p452_p1)
}
  0x21   :  { %29 = dma.hbm_to_vmem [thread:$0]  %s562_s1, 64, %s27_s12, [#allocation8]  }
  0x22   :  { %478 = dma.done.wait [#allocation5], 64  }
  0x23   :  { %479 = vsyncadd [#allocation5], 4294967232 }
  0x24   :  { %480 = dma.done.wait [#allocation8], 64  }
  0x25   :  { %481 = vsyncadd [#allocation8], 4294967232  ;;  %v48_v0 = vlaneseq  ;;  %vm40_vm0 = vcmask 9216   ;;  %v486_v1 = vmov 1983009808   ;;  %v487_v4 = vmov 0.0  }
  0x26   :  { %v46_v2 = vunpack.c.l.s4 %v486_v1  ;;  %41 = vst.msk [vmem:[#allocation2] sm:$0x3] %vm40_vm0, %v487_v4  ;;  %42 = vst.msk [vmem:[#allocation3] sm:$0x3] %vm40_vm0, %v487_v4  ;;  %v43_v7 = vld [vmem:[#allocation4] sm:$0xf] }
  0x27   :  { %v529_v3 = vshrl.u32 %v48_v0, 7  ;;  %vm55_vm1 = vcmask 1041408   ;;  %v170_v8 = vld [vmem:[#allocation7] sm:$0xf]  ;;  %v302_v63 = vand.u32 127, %v48_v0  ;;  %s488_s1 = smov [#allocation9]  }
  0x28   :  { %v47_v5 = vunpack.c.0.s8 %v46_v2  ;;  %s383_s4 = sshll.u32 %s488_s1, 4  ;;  %vm375_vm11 = vcmask 0   ;;  %s384_s4 = int_to_ptr.vmem [resolvable:$true] %s383_s4 }
  0x29   :  { %vm303_vm2 = vcmp.eq.s32.totalorder %v529_v3, %v302_v63  ;;  %s456_s7 = scalar_lea.vmem %s384_s4, 16  ;;  %s460_s8 = scalar_lea.vmem %s384_s4, 32 }
  0x2a   :  { %v50_v6 = vsub.s32 %v47_v5, %v529_v3  ;;  %p457_p2 = scmp.ne.s32.totalorder %s384_s4, %s456_s7  ;;  %p461_p3 = scmp.lt.s32.totalorder %s384_s4, %s384_s4 }
  0x2b   :  { %p462_p4 = scmp.lt.s32.totalorder %s460_s8, %s456_s7 }
  0x2c   :  { %v51_v9 = vrot.slane %v43_v7, %v50_v6  ;;  %v178_v10 = vrot.slane %v170_v8, %v50_v6 }
  0x2d   :  { %v85_v55 = vld [vmem:[#allocation2] sm:$0x3]  ;;  %v210_v56 = vld [vmem:[#allocation3] sm:$0x3]  ;;  %p463_p5 = por %p462_p4, %p461_p3 }
  0x2e   :  { %v52_v11 = vcombine.high %v51_v9, %v51_v9  ;;  %v56_v12 = vsel %vm55_vm1, %v51_v9, 0.0  ;;  %v179_v13 = vcombine.high %v178_v10, %v178_v10  ;;  %v182_v14 = vsel %vm55_vm1, %v178_v10, 0.0 }
  0x2f   :  { %v57_v15 = vrot.slane %v56_v12, 4  ;;  %v183_v16 = vrot.slane %v182_v14, 4  ;;  %p464_p6 = pnand %p463_p5, %p457_p2 }
  0x30   :  { %v63_v17 = vsel %vm55_vm1, %v52_v11, 0.0  ;;  %v189_v18 = vsel %vm55_vm1, %v179_v13, 0.0 }
  0x31   :  { %v58_v19 = vadd.f32 %v57_v15, %v56_v12  ;;  %v64_v20 = vrot.slane %v63_v17, 4  ;;  %v184_v21 = vadd.f32 %v183_v16, %v182_v14  ;;  %v190_v22 = vrot.slane %v189_v18, 4 }
  0x33   :  { %v59_v23 = vrot.slane %v58_v19, 2  ;;  %v65_v24 = vadd.f32 %v64_v20, %v63_v17  ;;  %v185_v25 = vrot.slane %v184_v21, 2  ;;  %v191_v26 = vadd.f32 %v190_v22, %v189_v18 }
  0x35   :  { %v60_v27 = vadd.f32 %v59_v23, %v58_v19  ;;  %v66_v28 = vrot.slane %v65_v24, 2  ;;  %v186_v29 = vadd.f32 %v185_v25, %v184_v21  ;;  %v192_v30 = vrot.slane %v191_v26, 2 }
  0x37   :  { %v61_v31 = vrot.slane %v60_v27, 1  ;;  %v67_v32 = vadd.f32 %v66_v28, %v65_v24  ;;  %v187_v33 = vrot.slane %v186_v29, 1  ;;  %v193_v34 = vadd.f32 %v192_v30, %v191_v26 }
  0x39   :  { %v62_v35 = vadd.f32 %v61_v31, %v60_v27  ;;  %v68_v36 = vrot.slane %v67_v32, 1  ;;  %v188_v37 = vadd.f32 %v187_v33, %v186_v29  ;;  %v194_v38 = vrot.slane %v193_v34, 1 }
  0x3b   :  { %v69_v39 = vadd.f32 %v68_v36, %v67_v32  ;;  %v71_v40 = vmul.f32 0.5, %v62_v35  ;;  %v195_v41 = vadd.f32 %v194_v38, %v193_v34  ;;  %v196_v42 = vmul.f32 0.5, %v188_v37 }
  0x3d   :  { %v72_v43 = vmul.f32 0.5, %v69_v39  ;;  %v197_v44 = vmul.f32 0.5, %v195_v41 }
  0x3f   :  { %v75_v45 = vcombine.low %v71_v40, %v72_v43  ;;  %v200_v46 = vcombine.low %v196_v42, %v197_v44 }
  0x41   :  { %v82_v47 = vrot.slane %v75_v45, %v50_v6  ;;  %v207_v48 = vrot.slane %v200_v46, %v50_v6 }
  0x43   :  { %v84_v49 = vsub.f32 %v43_v7, %v82_v47  ;;  %v209_v50 = vsub.f32 %v170_v8, %v207_v48 }
  0x45   :  { %v93_v51 = vrot.slane %v84_v49, %v50_v6  ;;  %v218_v52 = vrot.slane %v209_v50, %v50_v6 }
  0x47   :  { %v94_v53 = vcombine.high %v93_v51, %v93_v51  ;;  %v219_v54 = vcombine.high %v218_v52, %v218_v52 }
  0x49   :  { %97 = vmatprep.subr.mxu0 %v94_v53  ;;  %222 = vmatprep.subr.mxu1 %v219_v54 }
  0x4a   :  { %98 = vmatpush1.xpose.msra.mxu0 %v93_v51  ;;  %223 = vmatpush1.xpose.msra.mxu1 %v218_v52 }
  0x4b   :  { %161 = vmatprep.mubr.f32.mxu0 %v94_v53  ;;  %286 = vmatprep.mubr.f32.mxu1 %v219_v54 }
  0x4d   :  { %162 = vmatmul.mubr.f32.vlgmr.msra.gmra.mrb[0].mxu0 %v93_v51  ;;  %287 = vmatmul.mubr.f32.vlgmr.msra.gmra.mrb[0].mxu1 %v218_v52 }
 0x120   :  { %v163_v57 = vpop.f32.mrb[0].mxu0  ;;  %v288_v58 = vpop.f32.mrb[0].mxu1 }
 0x121   :  { %v167_v59 = vadd.f32 %v163_v57, %v85_v55  ;;  %v292_v60 = vadd.f32 %v288_v58, %v210_v56  ;;  %v165_v61 = vpop.f32.mrb[1].mxu0  ;;  %v290_v62 = vpop.f32.mrb[1].mxu1 }
 0x123   :  { %169 = vst.msk [vmem:[#allocation2] sm:$0x3] %vm40_vm0, %v167_v59  ;;  %293 = vst.msk [vmem:[#allocation3] sm:$0x3] %vm40_vm0, %v292_v60 }
 0x12a   :  { %v538_v1 = vld [vmem:[#allocation2] sm:$0x3]  ;;  %v540_v2 = vld [vmem:[#allocation3] sm:$0x3] }
 0x12b   :  { %v304_v4 = vsel %vm303_vm2, %v538_v1, 0.0  ;;  %v305_v6 = vsel %vm303_vm2, %v540_v2, 0.0 }
 0x12c   :  { %v306_v5 = vsel %vm40_vm0, %v304_v4, 0.0  ;;  %v331_v7 = vsel %vm40_vm0, %v305_v6, 0.0 }
 0x12d   :  { %307 = vadd.xlane.f32.xlu0 %v306_v5  ;;  %v317_v8 = vrot.slane %v306_v5, 4  ;;  %v342_v10 = vrot.slane %v331_v7, 4 }
 0x12f   :  { %v318_v9 = vadd.f32 %v317_v8, %v306_v5  ;;  %v343_v11 = vadd.f32 %v342_v10, %v331_v7 }
 0x131   :  { %332 = vadd.xlane.f32.xlu0 %v331_v7  ;;  %v319_v0 = vrot.slane %v318_v9, 2  ;;  %v344_v12 = vrot.slane %v343_v11, 2 }
 0x133   :  { %v320_v3 = vadd.f32 %v319_v0, %v318_v9  ;;  %v345_v14 = vadd.f32 %v344_v12, %v343_v11 }
 0x135   :  { %v321_v13 = vrot.slane %v320_v3, 1  ;;  %v346_v16 = vrot.slane %v345_v14, 1 }
 0x137   :  { %v322_v15 = vadd.f32 %v321_v13, %v320_v3  ;;  %v347_v17 = vadd.f32 %v346_v16, %v345_v14 }
 0x139   :  { %400 = vrsqrt.f32 %v322_v15  ;;  %vm325_vm3 = vcmp.eq.f32.partialorder %v322_v15, inf  ;;  %v328_v26 = vand.u32 2147483648, %v322_v15  ;;  %vm327_vm4 = vcmp.eq.f32.partialorder %v322_v15, 0.0 }
 0x13a   :  { %402 = vrsqrt.f32 %v347_v17  ;;  %vm350_vm6 = vcmp.eq.f32.partialorder %v347_v17, inf  ;;  %v353_v34 = vand.u32 2147483648, %v347_v17  ;;  %vm352_vm8 = vcmp.eq.f32.partialorder %v347_v17, 0.0 }
 0x143   :  { %v401_v19 = vpop.eup %400 }
 0x144   :  { %v324_v21 = vmul.f32 %v401_v19, %v322_v15  ;;  %v403_v22 = vpop.eup %402 }
 0x145   :  { %v349_v23 = vmul.f32 %v403_v22, %v347_v17 }
 0x146   :  { %v326_v24 = vsel %vm325_vm3, %v322_v15, %v324_v21 }
 0x147   :  { %v329_v29 = vsel %vm327_vm4, %v328_v26, %v326_v24  ;;  %v351_v31 = vsel %vm350_vm6, %v347_v17, %v349_v23 }
 0x148   :  { %v330_v37 = vadd.f32 1e-06, %v329_v29  ;;  %v354_v38 = vsel %vm352_vm8, %v353_v34, %v351_v31 }
 0x149   :  { %v355_v43 = vadd.f32 1e-06, %v354_v38 }
 0x1ba   :  { %v308_v18 = vpop.xlane.xlu0 %307 }
 0x1bb   :  { %404 = vrsqrt.f32 %v308_v18  ;;  %vm311_vm5 = vcmp.eq.f32.partialorder %v308_v18, inf  ;;  %v314_v28 = vand.u32 2147483648, %v308_v18  ;;  %vm313_vm7 = vcmp.eq.f32.partialorder %v308_v18, 0.0 }
 0x1be   :  { %v333_v20 = vpop.xlane.xlu0 %332 }
 0x1bf   :  { %406 = vrsqrt.f32 %v333_v20  ;;  %vm336_vm9 = vcmp.eq.f32.partialorder %v333_v20, inf  ;;  %v339_v39 = vand.u32 2147483648, %v333_v20  ;;  %vm338_vm10 = vcmp.eq.f32.partialorder %v333_v20, 0.0 }
 0x1c5   :  { %v405_v25 = vpop.eup %404 }
 0x1c6   :  { %v310_v27 = vmul.f32 %v405_v25, %v308_v18 }
 0x1c8   :  { %v312_v30 = vsel %vm311_vm5, %v308_v18, %v310_v27 }
 0x1c9   :  { %v407_v32 = vpop.eup %406  ;;  %v315_v33 = vsel %vm313_vm7, %v314_v28, %v312_v30 }
 0x1ca   :  { %v316_v35 = vadd.f32 1e-06, %v315_v33  ;;  %v335_v36 = vmul.f32 %v407_v32, %v333_v20 }
 0x1cc   :  { %v337_v40 = vsel %vm336_vm9, %v333_v20, %v335_v36  ;;  %v356_v41 = vmul.f32 %v330_v37, %v316_v35 }
 0x1cd   :  { %v340_v42 = vsel %vm338_vm10, %v339_v39, %v337_v40 }
 0x1ce   :  { %v341_v44 = vadd.f32 1e-06, %v340_v42  ;;  %408 = vrcp.f32 %v356_v41 }
 0x1d0   :  { %v359_v45 = vmul.f32 %v355_v43, %v341_v44 }
 0x1d2   :  { %410 = vrcp.f32 %v359_v45 }
 0x1d8   :  { %v409_v46 = vpop.eup %408 }
 0x1d9   :  { %v358_v48 = vmul.f32 %v409_v46, %v538_v1 }
 0x1dc   :  { %v411_v47 = vpop.eup %410 }
 0x1dd   :  { %v361_v49 = vmul.f32 %v411_v47, %v540_v2 }
 0x1df   :  { %v362_v50 = vmul.f32 %v361_v49, %v358_v48 }
 0x1e1   :  { %v363_v51 = vsel %vm40_vm0, %v362_v50, 0.0 }
 0x1e2   :  { %364 = vadd.xlane.f32.xlu1 %v363_v51 }
 0x26f   :  { %v365_v52 = vpop.xlane.xlu1 %364 }
 0x270   :  { %v366_v53 = vrot.slane %v365_v52, 4 }
 0x272   :  { %v367_v54 = vadd.f32 %v366_v53, %v365_v52 }
 0x274   :  { %v368_v55 = vrot.slane %v367_v54, 2 }
 0x276   :  { %v369_v56 = vadd.f32 %v368_v55, %v367_v54 }
 0x278   :  { %v370_v57 = vrot.slane %v369_v56, 1 }
 0x27a   :  { %v371_v58 = vadd.f32 %v370_v57, %v369_v56 }
 0x27c   :  { %393 = vpush %v371_v58 }
 0x2ad   :  { %s394_s5 = spop %393 }
 0x2ae   :  { %s373_s6 = smul.f32 1.5258789e-05, %s394_s5 }
 0x2b0   :  { %v374_v59 = vstv %s373_s6 }
 0x2b1   :  { %376 = vst.msk [vmem:[#allocation9] sm:$0x1] %vm375_vm11, %v374_v59 }
 0x2b2   :  { %467 = shalt.err (!%p464_p6)
}
 0x2b3   :  { %s468_s11 = scalar_lea.hbm %s563_s2, 16 }
 0x2b4   :  { %p469_p7 = scmp.ne.s32.totalorder %s563_s2, %s468_s11  ;;  %p472_p8 = scmp.lt.u32.totalorder %s468_s11, %s563_s2 }
 0x2b6   :  { %p474_p9 = pnand %p472_p8, %p469_p7 }
 0x2b8   :  { %477 = shalt.err (!%p474_p9)
}
 0x2b9   :  { %386 = dma.vmem_to_hbm [thread:$0]  %s384_s4, 16, %s563_s2, [#allocation6]  }
 0x2ba   :  { %482 = dma.done.wait [#allocation6], 16  }
 0x2bb   :  { %483 = vsyncadd [#allocation6], 4294967280 }
 0x2bc   :  { %390 = vsyncpa [#allocation5], 1 }
 0x2bd   :  { %391 = vsyncpa [#allocation8], 1 }
 0x2be   :  { %392 = vsyncpa [#allocation6], 1 }

</bundles_post_ra>
